<compile_context>
chip_gen: v6e
topology: v6e:2x2x1
jax: 0.10.0
libtpu: 0.0.40
codegen_flags: <defaults>
</compile_context>

<pallas_src>
import jax
import jax.numpy as jnp
from jax.experimental import pallas as pl
from jax.experimental.pallas import tpu as pltpu


def _round_up(x, m):
    return ((x + m - 1) // m) * m


def _pick_row_tile(total, cap):
    """Largest multiple-of-8 divisor of `total` that is <= cap (or `total`)."""
    if total <= cap:
        return total
    best = 8
    for cand in range(8, cap + 1, 8):
        if total % cand == 0:
            best = cand
    return best


def _vmem_limit_bytes():
    """Explicit scoped-VMEM limit: ~7/8 of physical, capped at 100 MiB
    (=> ~56 MiB on v7x's 64 MiB VMEM, 100 MiB on v5e/v6e's 128 MiB)."""
    try:
        cap = int(pltpu.get_tpu_info().vmem_capacity_bytes)
    except Exception:
        cap = 64 * 1024 * 1024
    return int(min(100 * 1024 * 1024, cap * 7 // 8))


# ---------------------------------------------------------------------------
# Kernel A: input-side gate matmuls, hoisted off the serial recurrence.
# ---------------------------------------------------------------------------
def _input_gates_kernel(emb_ref, wih_ref, b_ref, gr_ref, gz_ref, gn_ref):
    """
    emb_ref : (TR, Hp) bf16     embedding rows (t-major over (t, b))
    wih_ref : (3, Hp, Hp) bf16  per-gate W_ih^T stacked [r, z, n]
    b_ref   : (3, 1, Hp) f32    [b_ir+b_hr, b_iz+b_hz, b_in]
    g*_ref  : (TR, Hp) f32      pre-activation input gates (biases folded in)
    """
    x = emb_ref[...]
    gr_ref[...] = jnp.dot(x, wih_ref[0], preferred_element_type=jnp.float32) + b_ref[0]
    gz_ref[...] = jnp.dot(x, wih_ref[1], preferred_element_type=jnp.float32) + b_ref[1]
    gn_ref[...] = jnp.dot(x, wih_ref[2], preferred_element_type=jnp.float32) + b_ref[2]


# ---------------------------------------------------------------------------
# Kernel B: GRU recurrence, TT time steps per grid invocation.
# ---------------------------------------------------------------------------
def _make_gru_kernel(t_out, tt):
    def kernel(gir_ref, giz_ref, gin_ref, len_ref, whh_ref, bhn_ref,
               hm_ref, h_ref):
        """
        gi*_ref : (TT, BB, Hp) f32  precomputed input gates for this time block
        len_ref : (BB, 1) i32       sequence lengths (resident)
        whh_ref : (Hp, 3*Hp) bf16   fused W_hh^T, gate order [r | z | n]
        bhn_ref : (1, Hp) f32       b_hn (only hidden-side bias left in-loop)
        hm_ref  : (TT, BB, Hp) f32  masked hidden states (output block)
        h_ref   : (BB, Hp) f32      recurrent state carried across time blocks
        """
        tb = pl.program_id(1)
        hp = h_ref.shape[1]

        @pl.when(tb == 0)
        def _():
            h_ref[...] = jnp.zeros_like(h_ref)

        # Hoisted out of the unrolled loop (JAX does not CSE broadcasts).
        lengths = len_ref[...]            # (BB, 1) int32
        b_hn = bhn_ref[...]               # (1, Hp) f32

        def step(i, carry):
            t = tb * tt + i

            @pl.when(t < t_out)
            def _():
                h = h_ref[...]
                # Single fused (BB,Hp)@(Hp,3Hp) bf16 MXU op; lane slicing of
                # the result is tile-aligned since Hp % 128 == 0.
                gh = jnp.dot(h.astype(jnp.bfloat16), whh_ref[...],
                             preferred_element_type=jnp.float32)
                r = jax.nn.sigmoid(gir_ref[i] + gh[:, :hp])
                z = jax.nn.sigmoid(giz_ref[i] + gh[:, hp:2 * hp])
                n = jnp.tanh(gin_ref[i] + r * (gh[:, 2 * hp:] + b_hn))
                h_new = (1.0 - z) * n + z * h
                h_ref[...] = h_new
                # pad_packed_sequence semantics: zero beyond each length.
                mask = (t < lengths).astype(jnp.float32)
                hm_ref[i] = h_new * mask

            @pl.when(t >= t_out)
            def _():
                hm_ref[i] = jnp.zeros((hm_ref.shape[1], hm_ref.shape[2]),
                                      hm_ref.dtype)

            return carry

        jax.lax.fori_loop(0, tt, step, 0, unroll=min(tt, 8))

    return kernel


# ---------------------------------------------------------------------------
# Kernel C: output projection.  Vocab tiles outermost / rows innermost so the
# (Hp, V) weight is DMA'd from HBM exactly once (v5e/v6e bandwidth fix).
# ---------------------------------------------------------------------------
def _proj_kernel(h_ref, wp_ref, bp_ref, out_ref):
    out_ref[...] = (jnp.dot(h_ref[...].astype(jnp.bfloat16), wp_ref[...],
                            preferred_element_type=jnp.float32) + bp_ref[...])


def language_model_forward(x_ids, lengths, params):
    """x_ids: (T, B, 1) int32, lengths: python list of ints (len B)."""
    emb_tbl = params["embedding"]      # (V, H)
    w_ih = params["w_ih"]              # (3H, H)  gate order r, z, n
    w_hh = params["w_hh"]              # (3H, H)
    b_ih = params["b_ih"]              # (3H,)
    b_hh = params["b_hh"]              # (3H,)
    w_p = params["w_proj"]             # (V, H)
    b_p = params["b_proj"]             # (V,)

    T, B, _ = x_ids.shape
    H = emb_tbl.shape[1]
    V = w_p.shape[0]
    t_out = int(max(lengths))          # pad_packed_sequence output length

    # Lane-dense hidden dim: pad H to a multiple of 128.  Padded dims stay
    # exactly zero through the recurrence and contribute nothing to logits.
    hp = _round_up(H, 128)
    dh = hp - H
    vmem_limit = _vmem_limit_bytes()

    # ---- blocking ----
    tt = min(_round_up(t_out, 8), 32)          # time steps per grid step
    t_pad = _round_up(t_out, tt)
    nt = t_pad // tt
    nb = 2 if (B % 16 == 0) else 1             # batch split across v7x's 2 TCs
    bb = B // nb

    # ---- weight prep (one-time, wrapper-side); bf16 MXU operands ----
    emb_tbl_p = jnp.pad(emb_tbl, ((0, 0), (0, dh))).astype(jnp.bfloat16)

    wih_g = jnp.pad(jnp.transpose(w_ih.reshape(3, H, H), (0, 2, 1)),
                    ((0, 0), (0, dh), (0, dh))).astype(jnp.bfloat16)   # (3,Hp,Hp)
    whh_gt = jnp.pad(jnp.transpose(w_hh.reshape(3, H, H), (0, 2, 1)),
                     ((0, 0), (0, dh), (0, dh)))
    whh_cat = (jnp.transpose(whh_gt, (1, 0, 2))
               .reshape(hp, 3 * hp).astype(jnp.bfloat16))              # (Hp,3Hp)

    bi = b_ih.reshape(3, H).astype(jnp.float32)
    bh = b_hh.reshape(3, H).astype(jnp.float32)
    b_in = jnp.pad(jnp.stack([bi[0] + bh[0], bi[1] + bh[1], bi[2]], axis=0),
                   ((0, 0), (0, dh)))[:, None, :]                      # (3,1,Hp)
    bhn = jnp.pad(bh[2][None, :], ((0, 0), (0, dh)))                   # (1,Hp)

    # ---- embedding lookup (gather glue) + squeeze(2), time-padded ----
    emb = jnp.take(emb_tbl_p, x_ids[:t_out, :, 0], axis=0)             # (t_out,B,Hp)
    if t_pad > t_out:
        emb = jnp.pad(emb, ((0, t_pad - t_out), (0, 0), (0, 0)))
    rows = t_pad * B
    emb2d = emb.reshape(rows, hp)                                      # free reshape

    len_col = jnp.asarray(lengths, dtype=jnp.int32)[:, None]           # (B,1)

    # ---- Kernel A: input gates, parallel over row tiles ----
    tra = _pick_row_tile(rows, 256)
    gates_cost = pl.CostEstimate(
        flops=int(2 * rows * hp * 3 * hp), transcendentals=0,
        bytes_accessed=int(2 * rows * hp + 2 * 3 * hp * hp + 4 * 3 * rows * hp))
    gi_r, gi_z, gi_n = pl.pallas_call(
        _input_gates_kernel,
        out_shape=tuple(jax.ShapeDtypeStruct((rows, hp), jnp.float32)
                        for _ in range(3)),
        grid_spec=pltpu.PrefetchScalarGridSpec(
            num_scalar_prefetch=0,
            grid=(rows // tra,),
            in_specs=[
                pl.BlockSpec((tra, hp), lambda i: (i, 0)),
                pl.BlockSpec((3, hp, hp), lambda i: (0, 0, 0),
                             pipeline_mode=pl.Buffered(1)),   # resident weights
                pl.BlockSpec((3, 1, hp), lambda i: (0, 0, 0),
                             pipeline_mode=pl.Buffered(1)),
            ],
            out_specs=[pl.BlockSpec((tra, hp), lambda i: (i, 0))
                       for _ in range(3)],
        ),
        compiler_params=pltpu.CompilerParams(
            dimension_semantics=("parallel",), vmem_limit_bytes=vmem_limit),
        cost_estimate=gates_cost,
    )(emb2d, wih_g, b_in)

    gi_r = gi_r.reshape(t_pad, B, hp)
    gi_z = gi_z.reshape(t_pad, B, hp)
    gi_n = gi_n.reshape(t_pad, B, hp)

    # ---- Kernel B: serial recurrence (only h @ W_hh left on the chain) ----
    gru_cost = pl.CostEstimate(
        flops=int(t_out * (2 * B * hp * 3 * hp + 12 * B * hp)),
        transcendentals=int(t_out * 3 * B * hp),
        bytes_accessed=int(4 * 3 * t_pad * B * hp + 4 * t_pad * B * hp
                           + 2 * hp * 3 * hp))
    hm = pl.pallas_call(
        _make_gru_kernel(t_out, tt),
        out_shape=jax.ShapeDtypeStruct((t_pad, B, hp), jnp.float32),
        grid_spec=pltpu.PrefetchScalarGridSpec(
            num_scalar_prefetch=0,
            grid=(nb, nt),
            in_specs=[
                pl.BlockSpec((tt, bb, hp), lambda b, t: (t, b, 0)),
                pl.BlockSpec((tt, bb, hp), lambda b, t: (t, b, 0)),
                pl.BlockSpec((tt, bb, hp), lambda b, t: (t, b, 0)),
                pl.BlockSpec((bb, 1), lambda b, t: (b, 0)),
                pl.BlockSpec((hp, 3 * hp), lambda b, t: (0, 0),
                             pipeline_mode=pl.Buffered(1)),   # resident weights
                pl.BlockSpec((1, hp), lambda b, t: (0, 0),
                             pipeline_mode=pl.Buffered(1)),
            ],
            out_specs=pl.BlockSpec((tt, bb, hp), lambda b, t: (t, b, 0)),
            scratch_shapes=[pltpu.VMEM((bb, hp), jnp.float32)],   # recurrent h
        ),
        compiler_params=pltpu.CompilerParams(
            dimension_semantics=("parallel", "arbitrary"),
            vmem_limit_bytes=vmem_limit),
        cost_estimate=gru_cost,
    )(gi_r, gi_z, gi_n, len_col, whh_cat, bhn)

    # ---- Kernel C: projection over ALL rows (no HBM slice/pad round-trip) ----
    hm2 = hm.reshape(rows, hp)                                  # free reshape
    tr = _pick_row_tile(rows, 256)
    tv = min(_round_up(V, 128), 512)
    v_pad = _round_up(V, tv)
    wp_t = jnp.pad(jnp.transpose(w_p),
                   ((0, dh), (0, v_pad - V))).astype(jnp.bfloat16)   # (Hp,v_pad)
    bp = jnp.pad(b_p[None, :].astype(jnp.float32), ((0, 0), (0, v_pad - V)))

    proj_cost = pl.CostEstimate(
        flops=int(2 * rows * hp * v_pad), transcendentals=0,
        bytes_accessed=int(4 * rows * hp + 2 * hp * v_pad + 4 * v_pad
                           + 4 * rows * v_pad))
    logits2 = pl.pallas_call(
        _proj_kernel,
        out_shape=jax.ShapeDtypeStruct((rows, v_pad), jnp.float32),
        grid_spec=pltpu.PrefetchScalarGridSpec(
            num_scalar_prefetch=0,
            grid=(v_pad // tv, rows // tr),     # rows innermost: W read once
            in_specs=[
                pl.BlockSpec((tr, hp), lambda j, i: (i, 0)),
                pl.BlockSpec((hp, tv), lambda j, i: (0, j)),
                pl.BlockSpec((1, tv), lambda j, i: (0, j)),
            ],
            out_specs=pl.BlockSpec((tr, tv), lambda j, i: (i, j)),
        ),
        compiler_params=pltpu.CompilerParams(
            dimension_semantics=("parallel", "parallel"),
            vmem_limit_bytes=vmem_limit),
        cost_estimate=proj_cost,
    )(hm2, wp_t, bp)

    return logits2[:t_out * B, :V].reshape(t_out, B, V)


def _reference_forward(x_ids, lengths, params):
    """Pure-JAX f32 reference (scan-based GRU) for correctness check."""
    emb_tbl = params["embedding"]
    w_ih, w_hh = params["w_ih"], params["w_hh"]
    b_ih, b_hh = params["b_ih"], params["b_hh"]
    w_p, b_p = params["w_proj"], params["b_proj"]

    T, B, _ = x_ids.shape
    H = emb_tbl.shape[1]
    t_out = int(max(lengths))
    emb = jnp.take(emb_tbl, x_ids[:t_out, :, 0], axis=0)
    lengths_arr = jnp.asarray(lengths, dtype=jnp.int32)
    mask = (jnp.arange(t_out)[:, None] < lengths_arr[None, :]
            ).astype(jnp.float32)[:, :, None]

    def step(h, inputs):
        x, m = inputs
        gi = x @ w_ih.T + b_ih
        gh = h @ w_hh.T + b_hh
        i_r, i_z, i_n = jnp.split(gi, 3, axis=-1)
        h_r, h_z, h_n = jnp.split(gh, 3, axis=-1)
        r = jax.nn.sigmoid(i_r + h_r)
        z = jax.nn.sigmoid(i_z + h_z)
        n = jnp.tanh(i_n + r * h_n)
        h_new = (1.0 - z) * n + z * h
        return h_new, h_new * m

    _, hs = jax.lax.scan(step, jnp.zeros((B, H), jnp.float32), (emb, mask))
    return hs @ w_p.T + b_p


if __name__ == "__main__":
    # Small shapes consistent with the module: vocab V, hidden H, seq T, batch B
    V, H, T, B = 128, 32, 8, 2
    key = jax.random.PRNGKey(0)
    ks = jax.random.split(key, 8)
    bound = 1.0 / jnp.sqrt(jnp.float32(H))

    params = {
        "embedding": jax.random.normal(ks[0], (V, H), jnp.float32),
        "w_ih": jax.random.uniform(ks[1], (3 * H, H), jnp.float32, -bound, bound),
        "w_hh": jax.random.uniform(ks[2], (3 * H, H), jnp.float32, -bound, bound),
        "b_ih": jax.random.uniform(ks[3], (3 * H,), jnp.float32, -bound, bound),
        "b_hh": jax.random.uniform(ks[4], (3 * H,), jnp.float32, -bound, bound),
        "w_proj": jax.random.uniform(ks[5], (V, H), jnp.float32, -bound, bound),
        "b_proj": jax.random.uniform(ks[6], (V,), jnp.float32, -bound, bound),
    }

    x_ids = jax.random.randint(ks[7], (T, B, 1), 0, V, dtype=jnp.int32)
    lengths = [8, 5]

    logits = language_model_forward(x_ids, lengths, params)
    logits = jax.block_until_ready(logits)

    assert logits.shape == (max(lengths), B, V), logits.shape

    ref = _reference_forward(x_ids, lengths, params)
    # bf16 MXU operands (f32 accumulation / f32 recurrent state) vs f32
    # reference => loosened tolerance.
    assert jnp.allclose(logits, ref, atol=3e-2, rtol=3e-2), (
        float(jnp.max(jnp.abs(logits - ref))))

    print("KERNEL_OK")
</pallas_src>

<mosaic_0001>
module attributes {stable_mosaic.version = 11 : i64} {
  func.func @_input_gates_kernel(%arg0: i32, %arg1: memref<16x128xbf16, #tpu.memory_space<vmem>>, %arg2: memref<3x128x128xbf16, #tpu.memory_space<vmem>>, %arg3: memref<3x1x128xf32, #tpu.memory_space<vmem>>, %arg4: memref<16x128xf32, #tpu.memory_space<vmem>>, %arg5: memref<16x128xf32, #tpu.memory_space<vmem>>, %arg6: memref<16x128xf32, #tpu.memory_space<vmem>>) attributes {dimension_semantics = [#tpu.dimension_semantics<parallel>], iteration_bounds = array<i64: 1>, scalar_prefetch = 0 : i64, scratch_operands = 0 : i64, tpu.core_type = #tpu.core_type<tc>, window_params = [{transform_indices = @transform_0, window_bounds = array<i64: 16, 128>}, {pipeline_mode = #tpu.pipeline_mode<synchronous>, transform_indices = @transform_1, window_bounds = array<i64: 3, 128, 128>}, {pipeline_mode = #tpu.pipeline_mode<synchronous>, transform_indices = @transform_2, window_bounds = array<i64: 3, 1, 128>}, {transform_indices = @transform_3, window_bounds = array<i64: 16, 128>}, {transform_indices = @transform_4, window_bounds = array<i64: 16, 128>}, {transform_indices = @transform_5, window_bounds = array<i64: 16, 128>}]} {
    %c0 = arith.constant 0 : index
    %c0_0 = arith.constant 0 : index
    %0 = vector.load %arg1[%c0, %c0_0] : memref<16x128xbf16, #tpu.memory_space<vmem>>, vector<16x128xbf16>
    %c0_1 = arith.constant 0 : index
    %c0_2 = arith.constant 0 : index
    %c0_3 = arith.constant 0 : index
    %1 = vector.load %arg2[%c0_1, %c0_2, %c0_3] : memref<3x128x128xbf16, #tpu.memory_space<vmem>>, vector<1x128x128xbf16>
    %2 = vector.shape_cast %1 : vector<1x128x128xbf16> to vector<128x128xbf16>
    %cst = arith.constant dense<0.000000e+00> : vector<16x128xf32>
    %3 = tpu.matmul %0, %2, %cst {dimension_numbers = #tpu.dot_dimension_numbers<[1], [0], [0], [1], [0, 0, 1, 1], [], []>} : vector<16x128xbf16>, vector<128x128xbf16>, vector<16x128xf32> -> vector<16x128xf32>
    %c0_4 = arith.constant 0 : index
    %c0_5 = arith.constant 0 : index
    %c0_6 = arith.constant 0 : index
    %4 = vector.load %arg3[%c0_4, %c0_5, %c0_6] : memref<3x1x128xf32, #tpu.memory_space<vmem>>, vector<1x1x128xf32>
    %5 = vector.shape_cast %4 : vector<1x1x128xf32> to vector<1x128xf32>
    %6 = vector.broadcast %5 : vector<1x128xf32> to vector<16x128xf32>
    %7 = arith.addf %3, %6 : vector<16x128xf32>
    %c0_7 = arith.constant 0 : index
    %c0_8 = arith.constant 0 : index
    %8 = vector.load %arg4[%c0_7, %c0_8] : memref<16x128xf32, #tpu.memory_space<vmem>>, vector<16x128xf32>
    tpu.vector_store %arg4[%c0_7, %c0_8], %7 {strides = array<i32>} : memref<16x128xf32, #tpu.memory_space<vmem>>, vector<16x128xf32>,
    %c1 = arith.constant 1 : index
    %c0_9 = arith.constant 0 : index
    %c0_10 = arith.constant 0 : index
    %9 = vector.load %arg2[%c1, %c0_9, %c0_10] : memref<3x128x128xbf16, #tpu.memory_space<vmem>>, vector<1x128x128xbf16>
    %10 = vector.shape_cast %9 : vector<1x128x128xbf16> to vector<128x128xbf16>
    %cst_11 = arith.constant dense<0.000000e+00> : vector<16x128xf32>
    %11 = tpu.matmul %0, %10, %cst_11 {dimension_numbers = #tpu.dot_dimension_numbers<[1], [0], [0], [1], [0, 0, 1, 1], [], []>} : vector<16x128xbf16>, vector<128x128xbf16>, vector<16x128xf32> -> vector<16x128xf32>
    %c1_12 = arith.constant 1 : index
    %c0_13 = arith.constant 0 : index
    %c0_14 = arith.constant 0 : index
    %12 = vector.load %arg3[%c1_12, %c0_13, %c0_14] : memref<3x1x128xf32, #tpu.memory_space<vmem>>, vector<1x1x128xf32>
    %13 = vector.shape_cast %12 : vector<1x1x128xf32> to vector<1x128xf32>
    %14 = vector.broadcast %13 : vector<1x128xf32> to vector<16x128xf32>
    %15 = arith.addf %11, %14 : vector<16x128xf32>
    %c0_15 = arith.constant 0 : index
    %c0_16 = arith.constant 0 : index
    %16 = vector.load %arg5[%c0_15, %c0_16] : memref<16x128xf32, #tpu.memory_space<vmem>>, vector<16x128xf32>
    tpu.vector_store %arg5[%c0_15, %c0_16], %15 {strides = array<i32>} : memref<16x128xf32, #tpu.memory_space<vmem>>, vector<16x128xf32>,
    %c2 = arith.constant 2 : index
    %c0_17 = arith.constant 0 : index
    %c0_18 = arith.constant 0 : index
    %17 = vector.load %arg2[%c2, %c0_17, %c0_18] : memref<3x128x128xbf16, #tpu.memory_space<vmem>>, vector<1x128x128xbf16>
    %18 = vector.shape_cast %17 : vector<1x128x128xbf16> to vector<128x128xbf16>
    %cst_19 = arith.constant dense<0.000000e+00> : vector<16x128xf32>
    %19 = tpu.matmul %0, %18, %cst_19 {dimension_numbers = #tpu.dot_dimension_numbers<[1], [0], [0], [1], [0, 0, 1, 1], [], []>} : vector<16x128xbf16>, vector<128x128xbf16>, vector<16x128xf32> -> vector<16x128xf32>
    %c2_20 = arith.constant 2 : index
    %c0_21 = arith.constant 0 : index
    %c0_22 = arith.constant 0 : index
    %20 = vector.load %arg3[%c2_20, %c0_21, %c0_22] : memref<3x1x128xf32, #tpu.memory_space<vmem>>, vector<1x1x128xf32>
    %21 = vector.shape_cast %20 : vector<1x1x128xf32> to vector<1x128xf32>
    %22 = vector.broadcast %21 : vector<1x128xf32> to vector<16x128xf32>
    %23 = arith.addf %19, %22 : vector<16x128xf32>
    %c0_23 = arith.constant 0 : index
    %c0_24 = arith.constant 0 : index
    %24 = vector.load %arg6[%c0_23, %c0_24] : memref<16x128xf32, #tpu.memory_space<vmem>>, vector<16x128xf32>
    tpu.vector_store %arg6[%c0_23, %c0_24], %23 {strides = array<i32>} : memref<16x128xf32, #tpu.memory_space<vmem>>, vector<16x128xf32>,
    return
  }
  func.func @transform_0(%arg0: i32) -> (i32, i32) {
    %c0_i32 = arith.constant 0 : i32
    %c0_i32_0 = arith.constant 0 : i32
    return %arg0, %c0_i32 : i32, i32
  }
  func.func @transform_1(%arg0: i32) -> (i32, i32, i32) {
    %c0_i32 = arith.constant 0 : i32
    %c0_i32_0 = arith.constant 0 : i32
    %c0_i32_1 = arith.constant 0 : i32
    %c0_i32_2 = arith.constant 0 : i32
    return %c0_i32, %c0_i32_0, %c0_i32_1 : i32, i32, i32
  }
  func.func @transform_2(%arg0: i32) -> (i32, i32, i32) {
    %c0_i32 = arith.constant 0 : i32
    %c0_i32_0 = arith.constant 0 : i32
    %c0_i32_1 = arith.constant 0 : i32
    %c0_i32_2 = arith.constant 0 : i32
    return %c0_i32, %c0_i32_0, %c0_i32_1 : i32, i32, i32
  }
  func.func @transform_3(%arg0: i32) -> (i32, i32) {
    %c0_i32 = arith.constant 0 : i32
    %c0_i32_0 = arith.constant 0 : i32
    return %arg0, %c0_i32 : i32, i32
  }
  func.func @transform_4(%arg0: i32) -> (i32, i32) {
    %c0_i32 = arith.constant 0 : i32
    %c0_i32_0 = arith.constant 0 : i32
    return %arg0, %c0_i32 : i32, i32
  }
  func.func @transform_5(%arg0: i32) -> (i32, i32) {
    %c0_i32 = arith.constant 0 : i32
    %c0_i32_0 = arith.constant 0 : i32
    return %arg0, %c0_i32 : i32, i32
  }
}

</mosaic_0001>

<bundles_post_ra>
// kernel: tpu_custom_call.1
= control target key start
LH: loop header
LB: loop body
LE: loop exit
PB: predicated region body
PF: predicated region fallthrough
CT: control target
= control target key end

     0   :  { %11 = vsyncpa [#allocation3], 0  ;;  %s816_s0 = inlined_call_operand.hbm [shape: bf16[16,128], index: 0, kind: input, shape index: {}]   ;;  %s817_s1 = inlined_call_operand.hbm [shape: bf16[3,128,128], index: 1, kind: input, shape index: {}]   ;;  %s818_s2 = inlined_call_operand.vmem [shape: f32[3,1,128], index: 2, kind: input, shape index: {}]   ;;  %s819_s3 = inlined_call_operand.hbm [shape: f32[16,128], index: 3, kind: output, shape index: {0}]   ;;  %s820_s4 = inlined_call_operand.hbm [shape: f32[16,128], index: 4, kind: output, shape index: {1}]   ;;  %s821_s5 = inlined_call_operand.hbm [shape: f32[16,128], index: 5, kind: output, shape index: {2}]  }
   0x1   :  { %12 = vsyncpa [#allocation6], 0 }
   0x2   :  { %13 = vsyncpa [#allocation4], 0 }
   0x3   :  { %14 = vsyncpa [#allocation9], 0  ;;  %s712_s18 = smov [#allocation2]  }
   0x4   :  { %s20_s19 = sshll.u32 %s712_s18, 4  ;;  %s21_s19 = int_to_ptr.vmem [resolvable:$true] %s20_s19 }
   0x5   :  { %s612_s20 = scalar_lea.vmem %s21_s19, 128  ;;  %p617_p1 = scmp.lt.s32.totalorder %s21_s19, %s21_s19 }
   0x6   :  { %p613_p0 = scmp.ne.s32.totalorder %s21_s19, %s612_s20  ;;  %p618_p2 = scmp.lt.s32.totalorder %s612_s20, %s612_s20 }
   0x8   :  { %p619_p3 = por %p618_p2, %p617_p1 }
   0xa   :  { %p620_p4 = pnand %p619_p3, %p613_p0 }
   0xc   :  { %623 = shalt.err (!%p620_p4)
}
   0xd   :  { %s713_s21 = smov 64   ;;  %s714_s22 = smov 4  }
   0xe   :  { %26 = dma.hbm_to_vmem [thread:$0]  %s816_s0, 128, %s21_s19, [#allocation3], %s713_s21, %s713_s21, %s714_s22  }
   0xf   :  { %s715_s25 = smov [#allocation5]  }
  0x10   :  { %s32_s26 = sshll.u32 %s715_s25, 4  ;;  %s33_s26 = int_to_ptr.vmem [resolvable:$true] %s32_s26 }
  0x11   :  { %s632_s27 = scalar_lea.vmem %s33_s26, 3072  ;;  %p637_p6 = scmp.lt.s32.totalorder %s33_s26, %s33_s26 }
  0x12   :  { %p633_p5 = scmp.ne.s32.totalorder %s33_s26, %s632_s27  ;;  %p638_p7 = scmp.lt.s32.totalorder %s632_s27, %s632_s27 }
  0x14   :  { %p639_p8 = por %p638_p7, %p637_p6 }
  0x16   :  { %p640_p9 = pnand %p639_p8, %p633_p5 }
  0x18   :  { %643 = shalt.err (!%p640_p9)
}
  0x19   :  { %38 = dma.hbm_to_vmem [thread:$0]  %s817_s1, 3072, %s33_s26, [#allocation6], %s713_s21, %s713_s21, %s714_s22  }
  0x1a   :  { %704 = dma.done.wait [#allocation3], 128  }
  0x1b   :  { %705 = vsyncadd [#allocation3], 4294967168 }
  0x1c   :  { %706 = dma.done.wait [#allocation6], 3072  }
  0x1d   :  { %707 = vsyncadd [#allocation6], 4294964224  ;;  %v716_v0 = vmov 0.0   ;;  %vm717_vm0 = vmmov 0   ;;  %v579_v1 = vld [vmem:[#allocation5 + $0x38] sm:$0xff]   ;;  %v580_v2 = vld [vmem:[#allocation5 + $0x30] sm:$0xff]  }
  0x1e   :  { %508 = vmatprep.subr.bf16.mxu0 %v716_v0  ;;  %528 = vmatprep.subr.bf16.mxu1 %v716_v0  ;;  %v581_v3 = vld [vmem:[#allocation5 + $0x28] sm:$0xff]   ;;  %v586_v4 = vld [vmem:[#allocation5 + $0x78] sm:$0xff]   ;;  %v588_v5 = vld [vmem:[#allocation5 + $0x70] sm:$0xff]   ;;  %s718_s30 = smov [#allocation7]  }
  0x1f   :  { %524 = vmatprep.mubr.msk.bf16.mxu0 %vm717_vm0, %v716_v0  ;;  %544 = vmatprep.mubr.msk.bf16.mxu1 %vm717_vm0, %v716_v0  ;;  %v582_v6 = vld [vmem:[#allocation5 + $0x20] sm:$0xff]   ;;  %v591_v7 = vld [vmem:[#allocation5 + $0x68] sm:$0xff]   ;;  %v583_v8 = vld [vmem:[#allocation5 + $0x18] sm:$0xff]   ;;  %s407_s6 = sshll.u32 %s718_s30, 4  ;;  %s408_s6 = int_to_ptr.vmem [resolvable:$true] %s407_s6 }
  0x20   :  { %509 = vmatpush3.bf16.msra.mxu0 %v579_v1  ;;  %529 = vmatpush3.bf16.msra.mxu1 %v586_v4  ;;  %v593_v9 = vld [vmem:[#allocation5 + $0x60] sm:$0xff]   ;;  %v584_v10 = vld [vmem:[#allocation5 + $0x10] sm:$0xff]   ;;  %v595_v11 = vld [vmem:[#allocation5 + $0x58] sm:$0xff]   ;;  %s644_s9 = scalar_lea.vmem %s408_s6, 256  ;;  %p649_p11 = scmp.lt.s32.totalorder %s408_s6, %s408_s6 }
  0x21   :  { %510 = vmatprep.subr.bf16.mxu0 %v716_v0  ;;  %530 = vmatprep.subr.bf16.mxu1 %v716_v0  ;;  %v585_v12 = vld [vmem:[#allocation5 + $0x8] sm:$0xff]   ;;  %v597_v13 = vld [vmem:[#allocation5 + $0x50] sm:$0xff]   ;;  %v587_v14 = vld [vmem:[#allocation5] sm:$0xff]   ;;  %p645_p10 = scmp.ne.s32.totalorder %s408_s6, %s644_s9  ;;  %p650_p12 = scmp.lt.s32.totalorder %s644_s9, %s644_s9 }
  0x22   :  { %v589_v15 = vld [vmem:[#allocation2] sm:$0xff]   ;;  %v599_v16 = vld [vmem:[#allocation5 + $0x48] sm:$0xff]   ;;  %v601_v18 = vld [vmem:[#allocation5 + $0x40] sm:$0xff]  }
  0x23   :  { %v590_v17 = vld [vmem:[#allocation5 + $0xb8] sm:$0xff]   ;;  %v592_v19 = vld [vmem:[#allocation5 + $0xb0] sm:$0xff]   ;;  %v594_v20 = vld [vmem:[#allocation5 + $0xa8] sm:$0xff]   ;;  %p651_p13 = por %p650_p12, %p649_p11 }
  0x24   :  { %511 = vmatpush3.bf16.msra.mxu0 %v580_v2  ;;  %531 = vmatpush3.bf16.msra.mxu1 %v588_v5  ;;  %v596_v21 = vld [vmem:[#allocation5 + $0xa0] sm:$0xff]   ;;  %v598_v22 = vld [vmem:[#allocation5 + $0x98] sm:$0xff]   ;;  %v600_v23 = vld [vmem:[#allocation5 + $0x90] sm:$0xff]  }
  0x25   :  { %512 = vmatprep.subr.bf16.mxu0 %v716_v0  ;;  %532 = vmatprep.subr.bf16.mxu1 %v716_v0  ;;  %v602_v24 = vld [vmem:[#allocation5 + $0x88] sm:$0xff]   ;;  %v603_v25 = vld [vmem:[#allocation5 + $0x80] sm:$0xff]   ;;  %v451_v26 = vld [vmem:[%s818_s2] ss:$0 sm:$0xff]  ;;  %p652_p0 = pnand %p651_p13, %p645_p10 }
  0x26   :  { %v462_v32 = vld [vmem:[%s818_s2 + $0x1] ss:$0 sm:$0xff] }
  0x28   :  { %513 = vmatpush3.bf16.msra.mxu0 %v581_v3  ;;  %533 = vmatpush3.bf16.msra.mxu1 %v591_v7 }
  0x29   :  { %514 = vmatprep.subr.bf16.mxu0 %v716_v0  ;;  %534 = vmatprep.subr.bf16.mxu1 %v716_v0 }
  0x2c   :  { %515 = vmatpush3.bf16.msra.mxu0 %v582_v6  ;;  %535 = vmatpush3.bf16.msra.mxu1 %v593_v9 }
  0x2d   :  { %516 = vmatprep.subr.bf16.mxu0 %v716_v0  ;;  %536 = vmatprep.subr.bf16.mxu1 %v716_v0 }
  0x30   :  { %517 = vmatpush3.bf16.msra.mxu0 %v583_v8  ;;  %537 = vmatpush3.bf16.msra.mxu1 %v595_v11 }
  0x31   :  { %518 = vmatprep.subr.bf16.mxu0 %v716_v0  ;;  %538 = vmatprep.subr.bf16.mxu1 %v716_v0 }
  0x34   :  { %519 = vmatpush3.bf16.msra.mxu0 %v584_v10  ;;  %539 = vmatpush3.bf16.msra.mxu1 %v597_v13 }
  0x35   :  { %520 = vmatprep.subr.bf16.mxu0 %v716_v0  ;;  %540 = vmatprep.subr.bf16.mxu1 %v716_v0 }
  0x38   :  { %521 = vmatpush3.bf16.msra.mxu0 %v585_v12  ;;  %541 = vmatpush3.bf16.msra.mxu1 %v599_v16 }
  0x39   :  { %522 = vmatprep.subr.bf16.mxu0 %v716_v0  ;;  %542 = vmatprep.subr.bf16.mxu1 %v716_v0 }
  0x3c   :  { %523 = vmatpush3.bf16.msra.mxu0 %v587_v14  ;;  %543 = vmatpush3.bf16.msra.mxu1 %v601_v18 }
  0x3d   :  { %548 = vmatprep.subr.bf16.mxu0 %v716_v0 }
  0x3f   :  { %525 = vmatmul.mubr.bf16.vlgmr.msra.gmra.mxu0 %v589_v15  ;;  %545 = vmatmul.mubr.bf16.vlgmr.msra.gmra.mxu1 %v589_v15 }
  0x40   :  { %549 = vmatpush3.bf16.msra.mxu0 %v590_v17  ;;  %564 = vmatprep.mubr.msk.bf16.mxu0 %vm717_vm0, %v716_v0 }
  0x41   :  { %550 = vmatprep.subr.bf16.mxu0 %v716_v0 }
  0x44   :  { %551 = vmatpush3.bf16.msra.mxu0 %v592_v19 }
  0x45   :  { %552 = vmatprep.subr.bf16.mxu0 %v716_v0 }
  0x48   :  { %553 = vmatpush3.bf16.msra.mxu0 %v594_v20 }
  0x49   :  { %554 = vmatprep.subr.bf16.mxu0 %v716_v0 }
  0x4c   :  { %555 = vmatpush3.bf16.msra.mxu0 %v596_v21 }
  0x4d   :  { %556 = vmatprep.subr.bf16.mxu0 %v716_v0 }
  0x50   :  { %557 = vmatpush3.bf16.msra.mxu0 %v598_v22 }
  0x51   :  { %558 = vmatprep.subr.bf16.mxu0 %v716_v0 }
  0x54   :  { %559 = vmatpush3.bf16.msra.mxu0 %v600_v23 }
  0x55   :  { %560 = vmatprep.subr.bf16.mxu0 %v716_v0 }
  0x58   :  { %561 = vmatpush3.bf16.msra.mxu0 %v602_v24 }
  0x59   :  { %562 = vmatprep.subr.bf16.mxu0 %v716_v0 }
  0x5c   :  { %563 = vmatpush3.bf16.msra.mxu0 %v603_v25 }
  0x5f   :  { %565 = vmatmul.mubr.bf16.vlgmr.msra.gmra.mxu0 %v589_v15 }
  0xff   :  { %v161_v27 = vpop.f32.mrf.mxu0  ;;  %v277_v34 = vpop.f32.mrf.mxu1 }
 0x100   :  { %v162_v28 = vadd.f32 %v451_v26, %v161_v27  ;;  %v278_v35 = vadd.f32 %v462_v32, %v277_v34 }
 0x101   :  { %v526_v29 = vpop.f32.mrf.mxu0 }
 0x102   :  { %168 = vst [vmem:[#allocation7] sm:$0xff] %v162_v28 }
 0x103   :  { %v164_v30 = vpop.f32.mrf.mxu0 }
 0x104   :  { %v165_v31 = vadd.f32 %v451_v26, %v164_v30 }
 0x105   :  { %v527_v33 = vpop.f32.mrf.mxu0 }
 0x106   :  { %169 = vst [vmem:[#allocation7 + $0x8] sm:$0xff] %v165_v31 }
 0x107   :  { %655 = shalt.err (!%p652_p0)
}
 0x108   :  { %s719_s10 = smov 128   ;;  %s720_s11 = smov 8   ;;  %v546_v36 = vpop.f32.mrf.mxu1  ;;  %284 = vst [vmem:[#allocation8] sm:$0xff] %v278_v35 }
 0x109   :  { %413 = dma.vmem_to_hbm [thread:$0]  %s408_s6, 256, %s819_s3, [#allocation4], %s719_s10, %s719_s10, %s720_s11  }
 0x10a   :  { %s721_s14 = smov [#allocation8]   ;;  %v280_v37 = vpop.f32.mrf.mxu1 }
 0x10b   :  { %s419_s15 = sshll.u32 %s721_s14, 4  ;;  %v281_v38 = vadd.f32 %v462_v32, %v280_v37  ;;  %s420_s15 = int_to_ptr.vmem [resolvable:$true] %s419_s15 }
 0x10c   :  { %v547_v39 = vpop.f32.mrf.mxu1  ;;  %s664_s16 = scalar_lea.vmem %s420_s15, 256  ;;  %p669_p2 = scmp.lt.s32.totalorder %s420_s15, %s420_s15 }
 0x10d   :  { %285 = vst [vmem:[#allocation8 + $0x8] sm:$0xff] %v281_v38  ;;  %p665_p1 = scmp.ne.s32.totalorder %s420_s15, %s664_s16  ;;  %p670_p3 = scmp.lt.s32.totalorder %s664_s16, %s664_s16 }
 0x10f   :  { %p671_p4 = por %p670_p3, %p669_p2 }
 0x111   :  { %p672_p5 = pnand %p671_p4, %p665_p1 }
 0x113   :  { %675 = shalt.err (!%p672_p5)
}
 0x114   :  { %425 = dma.vmem_to_hbm [thread:$0]  %s420_s15, 256, %s820_s4, [#allocation9], %s719_s10, %s719_s10, %s720_s11  }
 0x115   :  { %v472_v40 = vld [vmem:[%s818_s2 + $0x2] ss:$0 sm:$0xff]  ;;  %s722_s20 = smov [#allocation10]  }
 0x116   :  { %s431_s21 = sshll.u32 %s722_s20, 4  ;;  %s432_s21 = int_to_ptr.vmem [resolvable:$true] %s431_s21 }
 0x117   :  { %s684_s22 = scalar_lea.vmem %s432_s21, 256  ;;  %p689_p7 = scmp.lt.s32.totalorder %s432_s21, %s432_s21 }
 0x118   :  { %p685_p6 = scmp.ne.s32.totalorder %s432_s21, %s684_s22  ;;  %p690_p8 = scmp.lt.s32.totalorder %s684_s22, %s684_s22 }
 0x11a   :  { %p691_p9 = por %p690_p8, %p689_p7 }
 0x11c   :  { %p692_p10 = pnand %p691_p9, %p685_p6 }
 0x11f   :  { %v393_v41 = vpop.f32.mrf.mxu0 }
 0x120   :  { %v394_v42 = vadd.f32 %v472_v40, %v393_v41 }
 0x121   :  { %v566_v43 = vpop.f32.mrf.mxu0 }
 0x122   :  { %400 = vst [vmem:[#allocation10] sm:$0xff] %v394_v42 }
 0x123   :  { %v396_v44 = vpop.f32.mrf.mxu0 }
 0x124   :  { %v397_v45 = vadd.f32 %v472_v40, %v396_v44 }
 0x125   :  { %v567_v46 = vpop.f32.mrf.mxu0 }
 0x126   :  { %401 = vst [vmem:[#allocation10 + $0x8] sm:$0xff] %v397_v45 }
 0x127   :  { %695 = shalt.err (!%p692_p10)
}
 0x128   :  { %437 = dma.vmem_to_hbm [thread:$0]  %s432_s21, 256, %s821_s5, [#allocation9], %s719_s10, %s719_s10, %s720_s11  }
 0x129   :  { %708 = dma.done.wait [#allocation4], 256  }
 0x12a   :  { %709 = vsyncadd [#allocation4], 4294967040 }
 0x12b   :  { %710 = dma.done.wait [#allocation9], 512  }
 0x12c   :  { %711 = vsyncadd [#allocation9], 4294966784 }
 0x12d   :  { %447 = vsyncpa [#allocation3], 1 }
 0x12e   :  { %448 = vsyncpa [#allocation6], 1 }
 0x12f   :  { %449 = vsyncpa [#allocation4], 1 }
 0x130   :  { %450 = vsyncpa [#allocation9], 1 }

</bundles_post_ra>
